<compile_context>
chip_gen: v7x
topology: tpu7x:2x2x1
jax: 0.10.0
libtpu: 0.0.40
codegen_flags: <defaults>
</compile_context>

<pallas_src>
import math

import jax
import jax.numpy as jnp
from jax.experimental import pallas as pl
from jax.experimental.pallas import tpu as pltpu


def _round_up(a, b):
    return ((a + b - 1) // b) * b


def _adpit_fused_kernel(x_ref, w_ref, b_ref, o_ref):
    # Single MXU matmul + VPU bias add + EUP tanh, everything in VMEM.
    y = jnp.dot(
        x_ref[...],
        w_ref[...],
        preferred_element_type=jnp.float32,
        precision=jax.lax.Precision.HIGHEST,
    )
    o_ref[...] = jnp.tanh(y + b_ref[...]).astype(o_ref.dtype)


def fuse_adpit_params(w1, b1, w2, b2):
    """One-time fusion of the two Linear layers (no nonlinearity between them).

    w1:(C, ffn), b1:(ffn,), w2:(ffn, out), b2:(out,)  (stored (in, out), i.e.
    transposed relative to torch's Linear (out, in)).
    Returns W:(C, out) f32 and b:(1, out) f32 with  tanh(x @ W + b) == forward.
    Call this once at parameter-prep time, not per forward call.
    """
    f32 = jnp.float32
    hp = jax.lax.Precision.HIGHEST
    w = jnp.dot(w1.astype(f32), w2.astype(f32), precision=hp)                 # (C, out)
    b = jnp.dot(b1.astype(f32)[None, :], w2.astype(f32), precision=hp)[0]     # (out,)
    b = b + b2.astype(f32)
    return w, b.reshape(1, -1)


def adpit_head_forward(x, w_fused, b_fused, *, tm=2048, out_dtype=None):
    """x: (B, T, C).  w_fused: (C, out) f32, b_fused: (1, out) f32 from fuse_adpit_params.

    Returns tanh(x @ W + b) with shape (B, T, out), dtype out_dtype (default x.dtype).
    """
    B, T, C = x.shape
    out_dim = w_fused.shape[1]
    out_dtype = x.dtype if out_dtype is None else out_dtype

    M = B * T
    # Row tile: multiple of 8, no larger than needed, and small enough that the
    # grid has >= 2 steps (so both v7x TensorCores get work when M allows).
    tm_eff = max(
        8,
        min(_round_up(tm, 8), _round_up(pl.cdiv(M, 2), 8), _round_up(M, 8)),
    )
    grid = (pl.cdiv(M, tm_eff),)   # ragged tail handled by Pallas (masked store)

    x2d = x.reshape(M, C).astype(jnp.float32)

    out2d = pl.pallas_call(
        _adpit_fused_kernel,
        out_shape=jax.ShapeDtypeStruct((M, out_dim), out_dtype),
        grid_spec=pltpu.PrefetchScalarGridSpec(
            num_scalar_prefetch=0,
            grid=grid,
            in_specs=[
                pl.BlockSpec((tm_eff, C), lambda i: (i, 0)),        # x row tile
                pl.BlockSpec((C, out_dim), lambda i: (0, 0)),       # fused W (resident)
                pl.BlockSpec((1, out_dim), lambda i: (0, 0)),       # fused bias
            ],
            out_specs=pl.BlockSpec((tm_eff, out_dim), lambda i: (i, 0)),
        ),
        compiler_params=pltpu.CompilerParams(
            dimension_semantics=("parallel",),   # shard row tiles across TCs (v7x)
        ),
    )(x2d, w_fused, b_fused)

    return out2d.reshape(B, T, out_dim)


def xavier_uniform(key, fan_in, fan_out, dtype=jnp.float32):
    """Matches torch.nn.init.xavier_uniform_ bound; returns (fan_in, fan_out)."""
    bound = math.sqrt(6.0 / (fan_in + fan_out))
    return jax.random.uniform(key, (fan_in, fan_out), dtype=dtype,
                              minval=-bound, maxval=bound)


def make_adpit_params(key, enc_out_dim, ffn_dim, nb_classes, n_tracks=3):
    out_dim = n_tracks * 3 * nb_classes
    k1, k2 = jax.random.split(key)
    # Stored transposed (in, out) vs torch's (out, in); biases zero as in init_head.
    w1 = xavier_uniform(k1, enc_out_dim, ffn_dim)
    b1 = jnp.zeros((ffn_dim,), jnp.float32)
    w2 = xavier_uniform(k2, ffn_dim, out_dim)
    b2 = jnp.zeros((out_dim,), jnp.float32)
    return w1, b1, w2, b2


if __name__ == "__main__":
    key = jax.random.PRNGKey(0)
    k_x, k_x2, k_p = jax.random.split(key, 3)

    enc_out_dim, ffn_dim, nb_classes, n_tracks = 32, 64, 4, 3
    out_dim = n_tracks * 3 * nb_classes  # 36
    w1, b1, w2, b2 = make_adpit_params(k_p, enc_out_dim, ffn_dim, nb_classes, n_tracks)

    # One-time parameter fusion (hoisted out of the per-call path).
    w_fused, b_fused = fuse_adpit_params(w1, b1, w2, b2)
    w_fused, b_fused = jax.block_until_ready((w_fused, b_fused))

    hp = jax.lax.Precision.HIGHEST

    def reference(xin):
        # Faithful (unfused) PyTorch semantics: Linear -> Linear -> tanh.
        Bq, Tq, _ = xin.shape
        h = jnp.dot(xin.reshape(Bq * Tq, enc_out_dim), w1, precision=hp) + b1
        y = jnp.tanh(jnp.dot(h, w2, precision=hp) + b2)
        return y.reshape(Bq, Tq, out_dim)

    # Case 1: small shape consistent with the module's forward (x : (B, T, C)).
    # M=16 -> tm_eff=8, grid=2 (exercises the multi-step / megacore path).
    B, T = 2, 8
    x = jax.random.normal(k_x, (B, T, enc_out_dim), dtype=jnp.float32)
    out = jax.block_until_ready(adpit_head_forward(x, w_fused, b_fused))
    assert out.shape == (B, T, out_dim)
    # Tolerance accounts for fp reassociation of the fused W1@W2 path vs. the
    # unfused highest-precision reference.
    assert jnp.allclose(out, reference(x), atol=5e-3, rtol=5e-3)

    # Case 2: M not a multiple of the row tile -> exercises the ragged tail
    # block (150 rows with tm=64 -> 3 grid steps, last one masked).
    B2, T2 = 3, 50
    x2 = jax.random.normal(k_x2, (B2, T2, enc_out_dim), dtype=jnp.float32)
    out2 = jax.block_until_ready(adpit_head_forward(x2, w_fused, b_fused, tm=64))
    assert out2.shape == (B2, T2, out_dim)
    assert jnp.allclose(out2, reference(x2), atol=5e-3, rtol=5e-3)

    print("KERNEL_OK")
</pallas_src>

<mosaic_0001>
module attributes {stable_mosaic.version = 11 : i64} {
  func.func @_adpit_fused_kernel(%arg0: i32, %arg1: memref<8x32xf32, #tpu.memory_space<vmem>>, %arg2: memref<32x36xf32, #tpu.memory_space<vmem>>, %arg3: memref<1x36xf32, #tpu.memory_space<vmem>>, %arg4: memref<8x36xf32, #tpu.memory_space<vmem>>) attributes {dimension_semantics = [#tpu.dimension_semantics<parallel>], iteration_bounds = array<i64: 2>, scalar_prefetch = 0 : i64, scratch_operands = 0 : i64, tpu.core_type = #tpu.core_type<tc>, window_params = [{transform_indices = @transform_0, window_bounds = array<i64: 8, 32>}, {pipeline_mode = #tpu.pipeline_mode<synchronous>, transform_indices = @transform_1, window_bounds = array<i64: 32, 36>}, {pipeline_mode = #tpu.pipeline_mode<synchronous>, transform_indices = @transform_2, window_bounds = array<i64: 1, 36>}, {transform_indices = @transform_3, window_bounds = array<i64: 8, 36>}]} {
    %c0 = arith.constant 0 : index
    %c0_0 = arith.constant 0 : index
    %0 = vector.load %arg1[%c0, %c0_0] : memref<8x32xf32, #tpu.memory_space<vmem>>, vector<8x32xf32>
    %c0_1 = arith.constant 0 : index
    %c0_2 = arith.constant 0 : index
    %1 = vector.load %arg2[%c0_1, %c0_2] : memref<32x36xf32, #tpu.memory_space<vmem>>, vector<32x36xf32>
    %cst = arith.constant dense<0.000000e+00> : vector<8x36xf32>
    %2 = tpu.matmul %0, %1, %cst {dimension_numbers = #tpu.dot_dimension_numbers<[1], [0], [0], [1], [0, 0, 1, 1], [], []>, precision = #tpu.contract_precision<fp32>} : vector<8x32xf32>, vector<32x36xf32>, vector<8x36xf32> -> vector<8x36xf32>
    %c0_3 = arith.constant 0 : index
    %c0_4 = arith.constant 0 : index
    %3 = vector.load %arg3[%c0_3, %c0_4] : memref<1x36xf32, #tpu.memory_space<vmem>>, vector<1x36xf32>
    %4 = vector.broadcast %3 : vector<1x36xf32> to vector<8x36xf32>
    %5 = arith.addf %2, %4 : vector<8x36xf32>
    %6 = math.tanh %5 : vector<8x36xf32>
    %c0_5 = arith.constant 0 : index
    %c0_6 = arith.constant 0 : index
    %7 = vector.load %arg4[%c0_5, %c0_6] : memref<8x36xf32, #tpu.memory_space<vmem>>, vector<8x36xf32>
    tpu.vector_store %arg4[%c0_5, %c0_6], %6 {strides = array<i32>} : memref<8x36xf32, #tpu.memory_space<vmem>>, vector<8x36xf32>,
    return
  }
  func.func @transform_0(%arg0: i32) -> (i32, i32) {
    %c0_i32 = arith.constant 0 : i32
    %c0_i32_0 = arith.constant 0 : i32
    return %arg0, %c0_i32 : i32, i32
  }
  func.func @transform_1(%arg0: i32) -> (i32, i32) {
    %c0_i32 = arith.constant 0 : i32
    %c0_i32_0 = arith.constant 0 : i32
    %c0_i32_1 = arith.constant 0 : i32
    return %c0_i32, %c0_i32_0 : i32, i32
  }
  func.func @transform_2(%arg0: i32) -> (i32, i32) {
    %c0_i32 = arith.constant 0 : i32
    %c0_i32_0 = arith.constant 0 : i32
    %c0_i32_1 = arith.constant 0 : i32
    return %c0_i32, %c0_i32_0 : i32, i32
  }
  func.func @transform_3(%arg0: i32) -> (i32, i32) {
    %c0_i32 = arith.constant 0 : i32
    %c0_i32_0 = arith.constant 0 : i32
    return %arg0, %c0_i32 : i32, i32
  }
}

</mosaic_0001>

<bundles_post_ra>
// kernel: tpu_custom_call.1
= control target key start
LH: loop header
LB: loop body
LE: loop exit
PB: predicated region body
PF: predicated region fallthrough
CT: control target
= control target key end

     0   :  { %8 = vsyncpa [#allocation3], 0  ;;  %s1405_s0 = inlined_call_operand.hbm [shape: f32[16,32], index: 0, kind: input, shape index: {}]   ;;  %s1406_s1 = inlined_call_operand.hbm [shape: f32[32,36], index: 1, kind: input, shape index: {}]   ;;  %s1407_s2 = inlined_call_operand.vmem [shape: f32[1,36], index: 2, kind: input, shape index: {}]   ;;  %s1408_s3 = inlined_call_operand.hbm [shape: f32[16,36], index: 3, kind: output, shape index: {}]  }
   0x1   :  { %10 = vsyncpa [#allocation3 + $0x1], 0 }
   0x2   :  { %11 = vsyncpa [#allocation6], 0 }
   0x3   :  { %12 = vsyncpa [#allocation4], 0 }
   0x4   :  { %14 = vsyncpa [#allocation4 + $0x1], 0  ;;  %s1178_s12 = smov 0   ;;  %s1180_s13 = smov 0  }
   0x5   :  { %s1182_s14 = smov 0   ;;  %s1184_s15 = smov 0  }
   0x6 LB: > { %s1199_s16 = sadd.s32 4294967295, %s1148_s15   ;;  %s799_s17 = sadd.s32 4294967294, %s1148_s15   ;;  %s1148_s15 = sphi %s1184_s15, %s1428_s15   ;;  %s1144_s14 = sphi %s1182_s14, %s1427_s14   ;;  %s1140_s13 = sphi %s1180_s13, %s1426_s13   ;;  %s1136_s12 = sphi %s1178_s12, %s1425_s12  }
   0x7   : > { %p40_p0 = scmp.ne.s32.totalorder %s1140_s13, %s1136_s12  ;;  %p1409_p1 = scmp.eq.s32.totalorder %s1199_s16, 0 }
   0x8   : > { %p112_p3 = scmp.eq.s32.totalorder %s799_s17, 1  ;;  %p800_p5 = scmp.ge.s32.totalorder %s1148_s15, 1 }
   0x9   : > { %p1208_p4 = por %p1409_p1, %p40_p0  ;;  %p119_p7 = scmp.lt.s32.totalorder %s1148_s15, 3 }
   0xa   : > { %p1213_p6 = por %p112_p3, %p40_p0  ;;  %s1150_s21 = smov [#allocation5]  }
   0xb   : > { %s1412_s18 = scalar_select %p1208_p4, 1, 0 }
   0xc   : > { %s1413_s19 = scalar_select %p1213_p6, 1, 0 }
   0xd   : > { %p1218_p8 = pnand %p800_p5, %p119_p7  ;;  %s131_s22 = sshll.u32 %s1150_s21, 4  ;;  %s1222_s22 = int_to_ptr.vmem [resolvable:$true] %s131_s22 }
   0xe   : > { %s1234_s24 = sadd.s32 1, %s1148_s15   ;;  %s27_s25 = sadd.s32 1, %s1144_s14 }
   0xf   : > { %s1414_s20 = scalar_select %p1218_p8, 1, 0 }
  0x10   : > { %p964_p9 = pneg %p1218_p8  ;;  %s24_s26 = ssub.s32 %s1148_s15, %s1234_s24 }
  0x11   : > { %s1020_s29 = scalar_lea.hbm %s1406_s1, 512 }
  0x12   : > { %p1229_p11 = pnand %p964_p9, %p1409_p1  ;;  %p1021_p12 = scmp.ne.s32.totalorder %s1406_s1, %s1020_s29 }
  0x13   : > { %p1027_p5 = scmp.lt.u32.totalorder %s1020_s29, %s1406_s1 }
  0x14   : > { %p1022_p13 = pneg %p1229_p11 }
  0x16   : > { %p1023_p0 = pnand %p1022_p13, %p1021_p12 }
  0x18   : > { %p1024_p3 = pneg %p1023_p0 }
  0x1a   : > { %p1029_p7 = pnand %p1027_p5, %p1024_p3 }
  0x1c   : > { %1032 = shalt.err (!%p1029_p7)
}
  0x1d   : > { %s1033_s7 = scalar_lea.vmem %s1222_s22, 512  ;;  %p1041_p2 = scmp.lt.s32.totalorder %s1222_s22, %s1222_s22 }
  0x1e   : > { %p1034_p9 = scmp.ne.s32.totalorder %s1222_s22, %s1033_s7  ;;  %p1042_p6 = scmp.lt.s32.totalorder %s1033_s7, %s1033_s7 }
  0x20   : > { %p1036_p10 = pnand %p1034_p9, %p1022_p13  ;;  %p1043_p4 = por %p1042_p6, %p1041_p2 }
  0x22   : > { %p1037_p1 = pneg %p1036_p10 }
  0x24   : > { %p1044_p8 = pnand %p1043_p4, %p1037_p1 }
  0x26   : > { %1047 = shalt.err (!%p1044_p8)
}
  0x27   : > { %s1151_s8 = smov 128   ;;  %s1152_s9 = smov 8  }
  0x28   : > { %967 = dma.hbm_to_vmem [thread:$0]  (!%p1229_p11), %s1406_s1, 512, %s1222_s22, [#allocation6], %s1151_s8, %s1151_s8, %s1152_s9  }
  0x29   : > { %p25_p2 = scmp.eq.s32.totalorder %s24_s26, 0  ;;  %p34_p1 = scmp.ne.s32.totalorder %s1144_s14, %s1140_s13 }
  0x2a   : > { %p35_p4 = scmp.eq.s32.totalorder %s1148_s15, 0  ;;  %p977_p6 = scmp.lt.s32.totalorder %s1148_s15, 2 }
  0x2b   : > { %s1265_s17 = scalar_select %p25_p2, %s1144_s14, %s27_s25  }
  0x2c   : > { %p36_p8 = por %p35_p4, %p34_p1  ;;  %p1416_p10 = scmp.eq.s32.totalorder %s1199_s16, 1 }
  0x2d   : > { %s148_s27 = sand.u32 1, %s1144_s14   ;;  %s804_s28 = sshll.u32 %s1148_s15, 7 }
  0x2e   : > { %p1269_p12 = por %p1416_p10, %p34_p1  ;;  %s803_s29 = sshll.u32 %s148_s27, 3 }
  0x2f   : > { %s1278_s4 = scalar_lea.hbm %s1405_s0, %s804_s28  ;;  %s152_s22 = scalar_lea.vmem [#allocation2], %s803_s29 }
  0x30   : > { %s159_s25 = sshll.u32 %s152_s22, 4  ;;  %p1280_p11 = pnand %p977_p6, %p36_p8  ;;  %s1284_s25 = int_to_ptr.vmem [resolvable:$true] %s159_s25 }
  0x31   : > { %s149_s5 = scalar_lea.sflag [#allocation3], %s148_s27  ;;  %s1048_s6 = scalar_lea.hbm %s1278_s4, 128 }
  0x32   : > { %p1049_p13 = scmp.ne.s32.totalorder %s1278_s4, %s1048_s6  ;;  %p1050_p0 = pneg %p1280_p11 }
  0x33   : > { %s1053_s9 = scalar_lea.hbm %s1405_s0, 256  ;;  %p1054_p7 = scmp.lt.u32.totalorder %s1278_s4, %s1405_s0 }
  0x34   : > { %p1051_p3 = pnand %p1050_p0, %p1049_p13  ;;  %p1055_p9 = scmp.lt.u32.totalorder %s1053_s9, %s1048_s6 }
  0x35   : > { %p1057_p1 = scmp.lt.u32.totalorder %s1048_s6, %s1278_s4 }
  0x36   : > { %p1052_p5 = pneg %p1051_p3  ;;  %p1056_p2 = por %p1055_p9, %p1054_p7 }
  0x38   : > { %p1058_p4 = por %p1057_p1, %p1056_p2 }
  0x3a   : > { %p1059_p6 = pnand %p1058_p4, %p1052_p5 }
  0x3c   : > { %1062 = shalt.err (!%p1059_p6)
}
  0x3d   : > { %s1063_s27 = scalar_lea.vmem %s1284_s25, 128  ;;  %s1153_s28 = smov [#allocation2]  }
  0x3e   : > { %p1064_p8 = scmp.ne.s32.totalorder %s1284_s25, %s1063_s27  ;;  %s1068_s29 = sshll.u32 %s1153_s28, 4  ;;  %s1069_s29 = int_to_ptr.vmem [resolvable:$false] %s1068_s29 }
  0x3f   : > { %s1070_s23 = scalar_lea.vmem %s1069_s29, 256  ;;  %p1071_p3 = scmp.lt.s32.totalorder %s1284_s25, %s1069_s29 }
  0x40   : > { %p1066_p10 = pnand %p1064_p8, %p1050_p0  ;;  %p1072_p7 = scmp.lt.s32.totalorder %s1070_s23, %s1063_s27 }
  0x42   : > { %p1067_p13 = pneg %p1066_p10  ;;  %p1073_p9 = por %p1072_p7, %p1071_p3 }
  0x44   : > { %p1074_p2 = pnand %p1073_p9, %p1067_p13 }
  0x46   : > { %1077 = shalt.err (!%p1074_p2)
}
  0x47   : > { %971 = dma.hbm_to_vmem [thread:$0]  (!%p1280_p11), %s1278_s4, 128, %s1284_s25, %s149_s5  }
  0x48   : > { %p1419_p5 = scmp.ne.s32.totalorder %s1414_s20, 0 }
  0x49   : > { %s1314_s30 = sand.u32 (!%p1419_p5), 1, %s1140_s13   ;;  %p1420_p0 = scmp.ne.s32.totalorder (!%p1419_p5), %s1412_s18, 0 }
  0x4a   : > { %168 = sbr.rel (%p1419_p5) target bundleno = 356 (0x164), region = 32  ;;  %s806_s22 = sshll.u32 (!%p1419_p5), %s1314_s30, 3 }
  0x4b   : > { %s171_s6 = scalar_lea.sflag (!%p1419_p5), [#allocation3], %s1314_s30  ;;  %s174_s7 = scalar_lea.vmem (!%p1419_p5), [#allocation2], %s806_s22 }
  0x51   : > { %1123 = dma.done.wait (%p1420_p0), %s171_s6, 128  }
  0x52   : > { %1125 = vsyncadd (%p1420_p0), %s171_s6, 4294967168  ;;  %p1421_p11 = scmp.eq.s32.totalorder %s1199_s16, 0 }
  0x54   : > { %1127 = dma.done.wait (%p1421_p11), [#allocation6], 512   ;;  %p1422_p1 = pmov %p1421_p11 }
  0x55   : > { %v1154_v0 = vmov 0.0|0.0   ;;  %vm1155_vm0 = vmmov 0   ;;  %v1156_v1 = vmov 0.0   ;;  %vm213_vm1 = vcmask 261120   ;;  %v202_v2 = vld [vmem:[#allocation5] sm:$0xff]  ;;  %v203_v3 = vld [vmem:[#allocation5 + $0x8] sm:$0xff] }
  0x56   : > { %1129 = vsyncadd (%p1422_p1), [#allocation6], 4294966784  ;;  %910 = vmatprep.subr.bf16.mxu1 %v1154_v0  ;;  %928 = vmatprep.subr.bf16.mxu0 %v1154_v0  ;;  %v204_v4 = vld [vmem:[#allocation5 + $0x10] sm:$0xff]  ;;  %v218_v5 = vand.u32 4294901760, %v202_v2  ;;  %v221_v6 = vand.u32 4294901760, %v203_v3  ;;  %v205_v7 = vld [vmem:[#allocation5 + $0x18] sm:$0xff] }
  0x57   : > { %852 = vmatprep.mubr.msk.f32.mxu1 %vm1155_vm0, %v1156_v1  ;;  %885 = vmatprep.mubr.msk.f32.mxu0 %vm1155_vm0, %v1156_v1  ;;  %v224_v8 = vand.u32 4294901760, %v204_v4  ;;  %v201_v9 = vld [vmem:[%s174_s7] sm:$0xff]  ;;  %v227_v10 = vand.u32 4294901760, %v205_v7  ;;  %s811_s4 = sshll.u32 %s1199_s16, 7  ;;  %s200_s25 = scalar_lea.vmem [#allocation7], %s806_s22  ;;  %vm703_vm2 = vcmask 293888  }
  0x58   : > { %v215_v11 = vsel %vm213_vm1, %v201_v9, 0  ;;  %v911_v12 = vpack.c.bf16 %v221_v6, %v218_v5  ;;  %v298_v13 = vsub.f32 %v202_v2, %v218_v5  ;;  %v305_v14 = vsub.f32 %v203_v3, %v221_v6  ;;  %v809_v41 = vld [vmem:[%s1407_s2] ss:$0 sm:$0xff]  ;;  %s719_s26 = sshll.u32 %s200_s25, 4  ;;  %s1361_s9 = scalar_lea.hbm %s1408_s3, %s811_s4  ;;  %s1363_s26 = int_to_ptr.vmem [resolvable:$true] %s719_s26 }
  0x59   : > { %v312_v15 = vsub.f32 %v204_v4, %v224_v8  ;;  %v319_v16 = vsub.f32 %v205_v7, %v227_v10  ;;  %v286_v17 = vand.u32 4294901760, %v215_v11  ;;  %v914_v18 = vpack.c.bf16 %v227_v10, %v224_v8  ;;  %s706_s10 = scalar_lea.sflag [#allocation4], %s1314_s30  ;;  %s1078_s11 = scalar_lea.vmem %s1363_s26, 128 }
  0x5a   : > { %912 = vmatpush3.bf16.msra.mxu1 %v911_v12  ;;  %930 = vmatpush3.bf16.msra.mxu0 %v911_v12  ;;  %v299_v19 = vand.u32 4294901760, %v298_v13  ;;  %v306_v20 = vand.u32 4294901760, %v305_v14  ;;  %v923_v39 = vpack.c.bf16 %v305_v14, %v298_v13  ;;  %p1079_p4 = scmp.ne.s32.totalorder %s1363_s26, %s1078_s11  ;;  %s1157_s16 = smov [#allocation7]  }
  0x5b   : > { %v313_v21 = vand.u32 4294901760, %v312_v15  ;;  %913 = vmatprep.subr.bf16.mxu1 %v1154_v0  ;;  %931 = vmatprep.subr.bf16.mxu0 %v1154_v0  ;;  %v287_v22 = vsub.f32 %v215_v11, %v286_v17  ;;  %v320_v23 = vand.u32 4294901760, %v319_v16  ;;  %v926_v40 = vpack.c.bf16 %v319_v16, %v312_v15  ;;  %s1082_s27 = sshll.u32 %s1157_s16, 4  ;;  %s1083_s27 = int_to_ptr.vmem [resolvable:$false] %s1082_s27 }
  0x5c   : > { %v300_v24 = vsub.f32 %v298_v13, %v299_v19  ;;  %v307_v25 = vsub.f32 %v305_v14, %v306_v20  ;;  %v935_v31 = vpack.c.bf16 %v306_v20, %v299_v19  ;;  %p1080_p6 = pnand %p1079_p4, %p1269_p12  ;;  %s1084_s28 = scalar_lea.vmem %s1083_s27, 256 }
  0x5d   : > { %v314_v26 = vsub.f32 %v312_v15, %v313_v21  ;;  %v288_v27 = vand.u32 4294901760, %v287_v22  ;;  %v321_v28 = vsub.f32 %v319_v16, %v320_v23  ;;  %v938_v37 = vpack.c.bf16 %v320_v23, %v313_v21  ;;  %p1085_p10 = scmp.lt.s32.totalorder %s1363_s26, %s1083_s27  ;;  %p1086_p13 = scmp.lt.s32.totalorder %s1084_s28, %s1078_s11 }
  0x5e   : > { %915 = vmatpush3.bf16.msra.mxu1 %v914_v18  ;;  %933 = vmatpush3.bf16.msra.mxu0 %v914_v18  ;;  %v301_v29 = vand.u32 4294901760, %v300_v24  ;;  %v308_v30 = vand.u32 4294901760, %v307_v25  ;;  %p1081_p8 = pneg %p1080_p6 }
  0x5f   : > { %v289_v32 = vsub.f32 %v287_v22, %v288_v27  ;;  %916 = vmatprep.subr.bf16.mxu1 %v1154_v0  ;;  %934 = vmatprep.subr.bf16.mxu0 %v1154_v0  ;;  %v315_v34 = vand.u32 4294901760, %v314_v26  ;;  %v322_v35 = vand.u32 4294901760, %v321_v28  ;;  %p1087_p3 = por %p1086_p13, %p1085_p10 }
  0x60   : > { %v917_v33 = vpack.c.bf16 %v308_v30, %v301_v29 }
  0x61   : > { %v290_v36 = vand.u32 4294901760, %v289_v32  ;;  %886 = vmatmul.mubr.f32.vlgmr.msra.gmra.mrb[0].mxu0 %v288_v27  ;;  %v920_v38 = vpack.c.bf16 %v322_v35, %v315_v34  ;;  %p1088_p7 = pnand %p1087_p3, %p1081_p8 }
  0x62   : > { %936 = vmatpush3.bf16.msra.mxu0 %v935_v31  ;;  %896 = vmatprep.mubr.msk.f32.mxu0 %vm1155_vm0, %v1156_v1 }
  0x63   : > { %853 = vmatmul.mubr.f32.vlgmr.msra.gmra.mrb[0].mxu1 %v290_v36  ;;  %937 = vmatprep.subr.bf16.mxu0 %v1154_v0 }
  0x64   : > { %918 = vmatpush3.bf16.msra.mxu1 %v917_v33  ;;  %863 = vmatprep.mubr.msk.f32.mxu1 %vm1155_vm0, %v1156_v1 }
  0x65   : > { %919 = vmatprep.subr.bf16.mxu1 %v1154_v0 }
  0x66   : > { %939 = vmatpush3.bf16.msra.mxu0 %v938_v37 }
  0x67   : > { %940 = vmatprep.subr.bf16.mxu0 %v1154_v0 }
  0x68   : > { %921 = vmatpush3.bf16.msra.mxu1 %v920_v38 }
  0x69   : > { %922 = vmatprep.subr.bf16.mxu1 %v1154_v0  ;;  %897 = vmatmul.mubr.f32.vlgmr.msra.gmra.mrb[0].mxu0 %v286_v17 }
  0x6a   : > { %942 = vmatpush3.bf16.msra.mxu0 %v911_v12  ;;  %907 = vmatprep.mubr.msk.f32.mxu0 %vm1155_vm0, %v1156_v1 }
  0x6b   : > { %864 = vmatmul.mubr.f32.vlgmr.msra.gmra.mrb[0].mxu1 %v286_v17  ;;  %943 = vmatprep.subr.bf16.mxu0 %v1154_v0 }
  0x6c   : > { %924 = vmatpush3.bf16.msra.mxu1 %v923_v39  ;;  %874 = vmatprep.mubr.msk.f32.mxu1 %vm1155_vm0, %v1156_v1 }
  0x6d   : > { %925 = vmatprep.subr.bf16.mxu1 %v1154_v0 }
  0x6e   : > { %945 = vmatpush3.bf16.msra.mxu0 %v914_v18 }
  0x70   : > { %927 = vmatpush3.bf16.msra.mxu1 %v926_v40 }
  0x71   : > { %908 = vmatmul.mubr.f32.vlgmr.msra.gmra.mrb[0].mxu0 %v286_v17 }
  0x73   : > { %875 = vmatmul.mubr.f32.vlgmr.msra.gmra.mrb[0].mxu1 %v287_v22 }
 0x144   : > { %v698_v42 = vpop.f32.mrb[0].mxu0 }
 0x145   : > { %v909_v43 = vpop.f32.mrb[1].mxu0 }
 0x146   : > { %v463_v44 = vpop.f32.mrb[0].mxu1 }
 0x147   : > { %v946_v45 = vadd.f32 %v809_v41, %v463_v44  ;;  %v876_v46 = vpop.f32.mrb[1].mxu1 }
 0x149   : > { %v947_v47 = vadd.f32 %v946_v45, %v698_v42 }
 0x14b   : > { %1018 = vtanh.f32 %v947_v47 }
 0x155   : > { %v1019_v48 = vpop.eup %1018 }
 0x156   : > { %704 = vst.msk [vmem:[%s200_s25] sm:$0xff] %vm703_vm2, %v1019_v48 }
 0x157   : > { %1091 = shalt.err (!%p1088_p7)
}
 0x158   : > { %s1092_s29 = scalar_lea.hbm %s1361_s9, 128  ;;  %s1096_s22 = scalar_lea.hbm %s1408_s3, 256 }
 0x159   : > { %p1093_p9 = scmp.ne.s32.totalorder %s1361_s9, %s1092_s29  ;;  %p1097_p0 = scmp.lt.u32.totalorder %s1361_s9, %s1408_s3 }
 0x15a   : > { %p1098_p11 = scmp.lt.u32.totalorder %s1096_s22, %s1092_s29  ;;  %p1100_p4 = scmp.lt.u32.totalorder %s1092_s29, %s1361_s9 }
 0x15b   : > { %p1094_p2 = pnand %p1093_p9, %p1269_p12 }
 0x15c   : > { %p1099_p1 = por %p1098_p11, %p1097_p0 }
 0x15d   : > { %p1095_p5 = pneg %p1094_p2 }
 0x15e   : > { %p1101_p6 = por %p1100_p4, %p1099_p1 }
 0x160   : > { %p1102_p8 = pnand %p1101_p6, %p1095_p5 }
 0x162   : > { %1105 = shalt.err (!%p1102_p8)
}
 0x163   : > { %962 = dma.vmem_to_hbm [thread:$0]  (%p1269_p12), %s1363_s26, 128, %s1361_s9, %s706_s10  }
 0x164 PF: > { %s731_s18 = sand.u32 1, %s1136_s12   ;;  %p1423_p10 = scmp.ne.s32.totalorder %s1413_s19, 0 }
 0x165   : > { %p1424_p13 = scmp.ge.s32.totalorder %s1148_s15, 2  ;;  %s732_s20 = scalar_lea.sflag [#allocation4], %s731_s18 }
 0x167   : > { %p973_p3 = pnand %p1424_p13, %p1423_p10 }
 0x169   : > { %1131 = dma.done.wait (!%p973_p3), %s732_s20, 128  }
 0x16a   : > { %1133 = vsyncadd (!%p973_p3), %s732_s20, 4294967168  ;;  %p17_p7 = scmp.ge.s32.totalorder %s1234_s24, 4   ;;  %s1425_s12 = smov %s1140_s13 }
 0x16b   : > { %s1426_s13 = smov %s1144_s14  ;;  %s1427_s14 = smov %s1265_s17 }
 0x16c   : > { %s1428_s15 = smov %s1234_s24  ;;  %19 = sbr.rel (!%p17_p7) target bundleno = 6 (0x6), region = 81 }
 0x173   :  { %737 = vsyncpa [#allocation3], 1 }
 0x174   :  { %739 = vsyncpa [#allocation3 + $0x1], 1 }
 0x175   :  { %740 = vsyncpa [#allocation6], 1 }
 0x176   :  { %741 = vsyncpa [#allocation4], 1 }
 0x177   :  { %743 = vsyncpa [#allocation4 + $0x1], 1 }

</bundles_post_ra>
